<compile_context>
chip_gen: v5e
topology: v5e:2x2
jax: 0.10.0
libtpu: 0.0.40
codegen_flags: <defaults>
</compile_context>

<pallas_src>
import functools

import numpy as np

import jax
import jax.numpy as jnp
from jax.experimental import pallas as pl
from jax.experimental.pallas import tpu as pltpu


# ----------------------------------------------------------------------------
# Hardware-aware VMEM budgets (v5e/v6e: 128 MiB per TC, v7x: 64 MiB per TC).
# ----------------------------------------------------------------------------
def _tpu_vmem_capacity_bytes():
    try:
        info = pltpu.get_tpu_info()
        cap = int(getattr(info, "vmem_capacity_bytes", 0))
        if cap > 0:
            return cap
    except Exception:
        pass
    return 128 * 1024 * 1024


_VMEM_CAP = _tpu_vmem_capacity_bytes()
_VMEM_LIMIT = min(int(_VMEM_CAP * 0.6), 112 * 1024 * 1024)   # scoped VMEM limit
_STEP_BUDGET = int(_VMEM_LIMIT * 0.7)                        # per-grid-step target


# ----------------------------------------------------------------------------
# Host-side helpers: interpolation matrices (cached) and tile selection.
# ----------------------------------------------------------------------------
@functools.lru_cache(maxsize=None)
def _interp_matrix_np(out_size, in_size, align_corners):
    """1-D bilinear interpolation matrix W of shape (out_size, in_size)."""
    i = np.arange(out_size, dtype=np.float64)
    if align_corners and out_size > 1:
        src = i * (in_size - 1) / max(out_size - 1, 1)
    else:
        src = (i + 0.5) * (in_size / out_size) - 0.5
    src = np.clip(src, 0.0, in_size - 1)
    i0 = np.clip(np.floor(src).astype(np.int64), 0, in_size - 1)
    i1 = np.minimum(i0 + 1, in_size - 1)
    w1 = src - i0
    w0 = 1.0 - w1
    w = np.zeros((out_size, in_size), dtype=np.float64)
    rows = np.arange(out_size)
    np.add.at(w, (rows, i0), w0)
    np.add.at(w, (rows, i1), w1)
    return w.astype(np.float32)


@functools.lru_cache(maxsize=None)
def _interp_matrices(h_out, h_in, w_out, w_in, align_corners, dtype_name):
    """Cached device arrays: Wh (Hout, Hin) and pre-transposed Ww^T (Win, Wout)."""
    dtype = np.dtype(dtype_name)
    wh = jnp.asarray(_interp_matrix_np(h_out, h_in, align_corners), dtype=dtype)
    wwt = jnp.asarray(_interp_matrix_np(w_out, w_in, align_corners).T, dtype=dtype)
    return wh, wwt


def _round_down(x, g):
    return max(g, (int(x) // g) * g)


def _pick_row_tile(h_out, per_row_bytes, fixed_bytes, budget=_STEP_BUDGET):
    """Largest multiple-of-8 Hout tile whose per-step VMEM footprint fits."""
    if h_out <= 8:
        return h_out
    avail = max(budget - fixed_bytes, 8 * per_row_bytes)
    th = int(avail // max(per_row_bytes, 1))
    th = min(th, 2048)
    if th >= h_out:
        return h_out
    return _round_down(th, 8)


def _pick_channel_block(nc, max_cb=8):
    # pl.cdiv grid + masked partial last block ⇒ no divisibility requirement.
    return min(nc, max_cb)


def _compute_dtype_for(x, compute_dtype):
    if compute_dtype is not None:
        return jnp.dtype(compute_dtype)
    return jnp.dtype(jnp.bfloat16) if x.dtype == jnp.bfloat16 else jnp.dtype(jnp.float32)


# ----------------------------------------------------------------------------
# Kernel 1: bilinear resize, height-first separable form.
#   height pass: batched (CB,TH,Hin) x (CB,Hin,Win) -> (CB,TH,Win)  [MXU]
#   width  pass: flat    (CB*TH,Win) x (Win,Wout)   -> (CB*TH,Wout) [MXU]
# No per-Hout-tile recompute; both grid axes stay "parallel".
# ----------------------------------------------------------------------------
def _bilinear_resize_kernel(x_ref, wh_ref, wwt_ref, o_ref):
    cb, h_in, w_in = x_ref.shape
    th = wh_ref.shape[0]
    w_out = wwt_ref.shape[1]
    wdt = wwt_ref.dtype

    x = x_ref[...].astype(wdt)                                   # (CB, Hin, Win)
    whb = jnp.broadcast_to(wh_ref[...], (cb, th, h_in))          # (CB, TH, Hin)
    tmp = jax.lax.dot_general(                                   # (CB, TH, Win)
        whb, x,
        dimension_numbers=(((2,), (1,)), ((0,), (0,))),
        preferred_element_type=jnp.float32)
    out = jnp.dot(tmp.reshape(cb * th, w_in).astype(wdt), wwt_ref[...],
                  preferred_element_type=jnp.float32)            # (CB*TH, Wout)
    o_ref[...] = out.reshape(cb, th, w_out).astype(o_ref.dtype)


def bilinear_interpolate(x, img_size, align_corners=False, compute_dtype=None):
    """Pallas equivalent of F.interpolate(x, size=img_size, mode='bilinear')."""
    n, c, h_in, w_in = x.shape
    h_out, w_out = img_size
    wdt = _compute_dtype_for(x, compute_dtype)
    wh, wwt = _interp_matrices(h_out, h_in, w_out, w_in,
                               bool(align_corners), wdt.name)

    nc = n * c
    cb = _pick_channel_block(nc)
    isz = np.dtype(x.dtype).itemsize
    wsz = wdt.itemsize
    # per-extra-output-row VMEM cost: out dbl-buf + f32 result + f32 height-pass
    # value + broadcast Wh + Wh dbl-buf;  fixed: x dbl-buf + cast + Ww^T dbl-buf.
    per_row = cb * w_out * (2 * isz + 4) + cb * w_in * 4 + cb * h_in * wsz + 2 * h_in * wsz
    fixed = cb * h_in * w_in * (2 * isz + wsz) + 2 * w_in * w_out * wsz
    th = _pick_row_tile(h_out, per_row, fixed)

    flops = 2 * nc * h_out * h_in * w_in + 2 * nc * h_out * w_in * w_out
    bytes_accessed = (nc * (h_in * w_in + h_out * w_out) * isz
                      + (h_out * h_in + w_in * w_out) * wsz)

    x_flat = x.reshape(nc, h_in, w_in)
    out = pl.pallas_call(
        _bilinear_resize_kernel,
        out_shape=jax.ShapeDtypeStruct((nc, h_out, w_out), x.dtype),
        grid=(pl.cdiv(nc, cb), pl.cdiv(h_out, th)),
        in_specs=[
            pl.BlockSpec((cb, h_in, w_in), lambda i, j: (i, 0, 0)),
            pl.BlockSpec((th, h_in), lambda i, j: (j, 0)),
            pl.BlockSpec((w_in, w_out), lambda i, j: (0, 0)),
        ],
        out_specs=pl.BlockSpec((cb, th, w_out), lambda i, j: (i, j, 0)),
        compiler_params=pltpu.CompilerParams(
            dimension_semantics=("parallel", "parallel"),
            vmem_limit_bytes=_VMEM_LIMIT),
        cost_estimate=pl.CostEstimate(flops=flops, transcendentals=0,
                                      bytes_accessed=bytes_accessed),
    )(x_flat, wh, wwt)
    return out.reshape(n, c, h_out, w_out)


# ----------------------------------------------------------------------------
# Kernel 2: softmax over the class axis, tiled over the spatial axis.
# ----------------------------------------------------------------------------
def _channel_softmax_kernel(x_ref, o_ref):
    x = x_ref[0].astype(jnp.float32)                 # (C, T)
    m = jnp.max(x, axis=0, keepdims=True)
    e = jnp.exp(x - m)
    s = jnp.sum(e, axis=0, keepdims=True)
    o_ref[0] = (e * pl.reciprocal(s, approx=False)).astype(o_ref.dtype)


def channel_softmax(x):
    """Pallas equivalent of F.softmax(x, dim=1) for NCHW input."""
    n, c, h, w = x.shape
    hw = h * w
    isz = np.dtype(x.dtype).itemsize
    # Per spatial column: in/out double-buffers + f32 working copies.
    per_col = c * (4 * isz + 8)
    budget = min(_STEP_BUDGET, 24 * 1024 * 1024)
    t = int(budget // max(per_col, 1))
    t = min(t, 1 << 16)
    t = hw if t >= hw else _round_down(t, 128)        # lane-dense tiles

    x_flat = x.reshape(n, c, hw)
    out = pl.pallas_call(
        _channel_softmax_kernel,
        out_shape=jax.ShapeDtypeStruct((n, c, hw), x.dtype),
        grid=(n, pl.cdiv(hw, t)),
        in_specs=[pl.BlockSpec((1, c, t), lambda i, j: (i, 0, j))],
        out_specs=pl.BlockSpec((1, c, t), lambda i, j: (i, 0, j)),
        compiler_params=pltpu.CompilerParams(
            dimension_semantics=("parallel", "parallel"),
            vmem_limit_bytes=_VMEM_LIMIT),
        cost_estimate=pl.CostEstimate(flops=5 * n * c * hw,
                                      transcendentals=n * c * hw,
                                      bytes_accessed=2 * n * c * hw * isz),
    )(x_flat)
    return out.reshape(n, c, h, w)


# ----------------------------------------------------------------------------
# Kernel 3: fused bilinear resize + channel softmax (slide-mode crop path).
# One grid step produces all C channels of one (TH, Wout) output slab, so the
# full-resolution logits never round-trip through HBM before the softmax.
# ----------------------------------------------------------------------------
def _fused_resize_softmax_kernel(x_ref, wh_ref, wwt_ref, o_ref):
    _, c, h_in, w_in = x_ref.shape
    th = wh_ref.shape[0]
    w_out = wwt_ref.shape[1]
    wdt = wwt_ref.dtype

    x = x_ref[0].astype(wdt)                                     # (C, Hin, Win)
    whb = jnp.broadcast_to(wh_ref[...], (c, th, h_in))           # (C, TH, Hin)
    tmp = jax.lax.dot_general(                                   # (C, TH, Win)
        whb, x,
        dimension_numbers=(((2,), (1,)), ((0,), (0,))),
        preferred_element_type=jnp.float32)
    r = jnp.dot(tmp.reshape(c * th, w_in).astype(wdt), wwt_ref[...],
                preferred_element_type=jnp.float32).reshape(c, th, w_out)
    m = jnp.max(r, axis=0, keepdims=True)
    e = jnp.exp(r - m)
    s = jnp.sum(e, axis=0, keepdims=True)
    o_ref[0] = (e * pl.reciprocal(s, approx=False)).astype(o_ref.dtype)


def bilinear_resize_softmax(x, img_size, align_corners=False, compute_dtype=None):
    """Fused F.interpolate(x, img_size, 'bilinear') -> F.softmax(dim=1)."""
    n, c, h_in, w_in = x.shape
    h_out, w_out = img_size
    wdt = _compute_dtype_for(x, compute_dtype)
    wh, wwt = _interp_matrices(h_out, h_in, w_out, w_in,
                               bool(align_corners), wdt.name)
    isz = np.dtype(x.dtype).itemsize
    wsz = wdt.itemsize
    per_row = c * w_out * (2 * isz + 12) + c * w_in * 4 + c * h_in * wsz + 2 * h_in * wsz
    fixed = c * h_in * w_in * (2 * isz + wsz) + 2 * w_in * w_out * wsz
    th = _pick_row_tile(h_out, per_row, fixed)

    flops = (2 * n * c * h_out * h_in * w_in + 2 * n * c * h_out * w_in * w_out
             + 5 * n * c * h_out * w_out)
    bytes_accessed = (n * c * (h_in * w_in + h_out * w_out) * isz
                      + (h_out * h_in + w_in * w_out) * wsz)

    out = pl.pallas_call(
        _fused_resize_softmax_kernel,
        out_shape=jax.ShapeDtypeStruct((n, c, h_out, w_out), x.dtype),
        grid=(n, pl.cdiv(h_out, th)),
        in_specs=[
            pl.BlockSpec((1, c, h_in, w_in), lambda b, j: (b, 0, 0, 0)),
            pl.BlockSpec((th, h_in), lambda b, j: (j, 0)),
            pl.BlockSpec((w_in, w_out), lambda b, j: (0, 0)),
        ],
        out_specs=pl.BlockSpec((1, c, th, w_out), lambda b, j: (b, 0, j, 0)),
        compiler_params=pltpu.CompilerParams(
            dimension_semantics=("parallel", "parallel"),
            vmem_limit_bytes=_VMEM_LIMIT),
        cost_estimate=pl.CostEstimate(flops=flops,
                                      transcendentals=n * c * h_out * w_out,
                                      bytes_accessed=bytes_accessed),
    )(x, wh, wwt)
    return out


# ----------------------------------------------------------------------------
# BaseSegmentor-equivalent wrappers (glue in plain JAX, hot paths in Pallas).
# ----------------------------------------------------------------------------
class BaseSegmentorPallas:
    """Mirrors the compute of ssseg BaseSegmentor's base-class methods."""

    def __init__(self, num_classes, align_corners=False, use_probs_before_resize=True):
        self.num_classes = num_classes
        self.align_corners = align_corners
        self.use_probs_before_resize = use_probs_before_resize

    def customizepredsandlosses(self, seg_logits, img_size):
        # predictions['loss_cls'] = F.interpolate(seg_logits, img_size, 'bilinear')
        # TODO(synk): auxiliary decoders + calculatelosses need external builders/cfgs.
        return {"loss_cls": bilinear_interpolate(seg_logits, img_size, self.align_corners)}

    def inference_whole(self, seg_logits):
        # 'whole' mode: seg_logits = forward(...); optional softmax over classes.
        if self.use_probs_before_resize:
            return channel_softmax(seg_logits)
        return seg_logits

    def inference_slide_crop(self, seg_logits_crop, crop_size):
        # 'slide' mode per-crop path: resize to crop size, then channel softmax.
        # TODO(synk): sliding-window padding/accumulation (count_mat) not reproduced.
        if self.use_probs_before_resize:
            return bilinear_resize_softmax(seg_logits_crop, crop_size, self.align_corners)
        return bilinear_interpolate(seg_logits_crop, crop_size, self.align_corners)


if __name__ == "__main__":
    key = jax.random.PRNGKey(0)
    # Decode-head logits: (batch=2, num_classes=8, spatial 16x16), NCHW.
    seg_logits = jax.random.normal(key, (2, 8, 16, 16), dtype=jnp.float32)
    img_size = (32, 32)

    segmentor = BaseSegmentorPallas(num_classes=8, align_corners=False,
                                    use_probs_before_resize=True)

    preds = segmentor.customizepredsandlosses(seg_logits, img_size)
    probs_whole = segmentor.inference_whole(seg_logits)
    probs_crop = segmentor.inference_slide_crop(seg_logits, img_size)
    jax.block_until_ready((preds["loss_cls"], probs_whole, probs_crop))

    # Sanity check against a plain-JAX reference of the same math.
    wh_ref = jnp.asarray(_interp_matrix_np(img_size[0], 16, False))
    ww_ref = jnp.asarray(_interp_matrix_np(img_size[1], 16, False))
    ref_resize = jnp.einsum("oh,nchw,pw->ncop", wh_ref, seg_logits, ww_ref)
    ref_whole = jax.nn.softmax(seg_logits, axis=1)
    ref_crop = jax.nn.softmax(ref_resize, axis=1)

    assert jnp.allclose(preds["loss_cls"], ref_resize, atol=1e-5, rtol=1e-5)
    assert jnp.allclose(probs_whole, ref_whole, atol=2e-3, rtol=2e-3)
    assert jnp.allclose(probs_crop, ref_crop, atol=2e-3, rtol=2e-3)

    print("KERNEL_OK")
</pallas_src>

<mosaic_0001>
module attributes {stable_mosaic.version = 11 : i64} {
  func.func @_bilinear_resize_kernel(%arg0: i32, %arg1: i32, %arg2: memref<8x16x16xf32, #tpu.memory_space<vmem>>, %arg3: memref<32x16xf32, #tpu.memory_space<vmem>>, %arg4: memref<16x32xf32, #tpu.memory_space<vmem>>, %arg5: memref<8x32x32xf32, #tpu.memory_space<vmem>>) attributes {dimension_semantics = [#tpu.dimension_semantics<parallel>, #tpu.dimension_semantics<parallel>], iteration_bounds = array<i64: 2, 1>, scalar_prefetch = 0 : i64, scratch_operands = 0 : i64, tpu.core_type = #tpu.core_type<tc>, window_params = [{transform_indices = @transform_0, window_bounds = array<i64: 8, 16, 16>}, {transform_indices = @transform_1, window_bounds = array<i64: 32, 16>}, {pipeline_mode = #tpu.pipeline_mode<synchronous>, transform_indices = @transform_2, window_bounds = array<i64: 16, 32>}, {transform_indices = @transform_3, window_bounds = array<i64: 8, 32, 32>}]} {
    %c0 = arith.constant 0 : index
    %c0_0 = arith.constant 0 : index
    %c0_1 = arith.constant 0 : index
    %0 = vector.load %arg2[%c0, %c0_0, %c0_1] : memref<8x16x16xf32, #tpu.memory_space<vmem>>, vector<8x16x16xf32>
    %c0_2 = arith.constant 0 : index
    %c0_3 = arith.constant 0 : index
    %1 = vector.load %arg3[%c0_2, %c0_3] : memref<32x16xf32, #tpu.memory_space<vmem>>, vector<32x16xf32>
    %2 = vector.shape_cast %1 : vector<32x16xf32> to vector<1x32x16xf32>
    %3 = vector.broadcast %2 : vector<1x32x16xf32> to vector<8x32x16xf32>
    %cst = arith.constant dense<0.000000e+00> : vector<8x32x16xf32>
    %4 = tpu.matmul %3, %0, %cst {dimension_numbers = #tpu.dot_dimension_numbers<[2], [1], [1], [2], [0, 0, 0, 1, 1, 2], [0], [0]>} : vector<8x32x16xf32>, vector<8x16x16xf32>, vector<8x32x16xf32> -> vector<8x32x16xf32>
    %5 = vector.shape_cast %4 : vector<8x32x16xf32> to vector<256x16xf32>
    %c0_4 = arith.constant 0 : index
    %c0_5 = arith.constant 0 : index
    %6 = vector.load %arg4[%c0_4, %c0_5] : memref<16x32xf32, #tpu.memory_space<vmem>>, vector<16x32xf32>
    %cst_6 = arith.constant dense<0.000000e+00> : vector<256x32xf32>
    %7 = tpu.matmul %5, %6, %cst_6 {dimension_numbers = #tpu.dot_dimension_numbers<[1], [0], [0], [1], [0, 0, 1, 1], [], []>} : vector<256x16xf32>, vector<16x32xf32>, vector<256x32xf32> -> vector<256x32xf32>
    %8 = vector.shape_cast %7 : vector<256x32xf32> to vector<8x32x32xf32>
    %c0_7 = arith.constant 0 : index
    %c0_8 = arith.constant 0 : index
    %c0_9 = arith.constant 0 : index
    %9 = vector.load %arg5[%c0_7, %c0_8, %c0_9] : memref<8x32x32xf32, #tpu.memory_space<vmem>>, vector<8x32x32xf32>
    tpu.vector_store %arg5[%c0_7, %c0_8, %c0_9], %8 {strides = array<i32>} : memref<8x32x32xf32, #tpu.memory_space<vmem>>, vector<8x32x32xf32>,
    return
  }
  func.func @transform_0(%arg0: i32, %arg1: i32) -> (i32, i32, i32) {
    %c0_i32 = arith.constant 0 : i32
    %c0_i32_0 = arith.constant 0 : i32
    %c0_i32_1 = arith.constant 0 : i32
    return %arg0, %c0_i32, %c0_i32_0 : i32, i32, i32
  }
  func.func @transform_1(%arg0: i32, %arg1: i32) -> (i32, i32) {
    %c0_i32 = arith.constant 0 : i32
    %c0_i32_0 = arith.constant 0 : i32
    return %arg1, %c0_i32 : i32, i32
  }
  func.func @transform_2(%arg0: i32, %arg1: i32) -> (i32, i32) {
    %c0_i32 = arith.constant 0 : i32
    %c0_i32_0 = arith.constant 0 : i32
    %c0_i32_1 = arith.constant 0 : i32
    return %c0_i32, %c0_i32_0 : i32, i32
  }
  func.func @transform_3(%arg0: i32, %arg1: i32) -> (i32, i32, i32) {
    %c0_i32 = arith.constant 0 : i32
    %c0_i32_0 = arith.constant 0 : i32
    return %arg0, %arg1, %c0_i32 : i32, i32, i32
  }
}

</mosaic_0001>

<bundles_post_ra>
// kernel: tpu_custom_call.1
= control target key start
LH: loop header
LB: loop body
LE: loop exit
PB: predicated region body
PF: predicated region fallthrough
CT: control target
= control target key end

     0   :  { %8 = vsyncpa [#allocation3], 0  ;;  %s1442_s0 = inlined_call_operand.hbm [shape: f32[16,16,16], index: 0, kind: input, shape index: {}]   ;;  %s1443_s1 = inlined_call_operand.vmem [shape: f32[32,16], index: 1, kind: input, shape index: {}]   ;;  %s1444_s2 = inlined_call_operand.vmem [shape: f32[16,32], index: 2, kind: input, shape index: {}]   ;;  %s1445_s3 = inlined_call_operand.hbm [shape: f32[16,32,32], index: 3, kind: output, shape index: {}]  }
   0x1   :  { %10 = vsyncpa [#allocation3 + $0x1], 0 }
   0x2   :  { %11 = vsyncpa [#allocation4], 0 }
   0x3   :  { %13 = vsyncpa [#allocation4 + $0x1], 0  ;;  %s1154_s12 = smov 0   ;;  %s1156_s13 = smov 0  }
   0x4   :  { %s1158_s14 = smov 0   ;;  %s1160_s15 = smov 0  }
   0x5   :  { %s1162_s16 = smov 0   ;;  %s1164_s17 = smov 0  }
   0x6 LB: > { %s858_s18 = sadd.s32 4294967295, %s1128_s17   ;;  %s859_s19 = sadd.s32 4294967294, %s1128_s17   ;;  %s1128_s17 = sphi %s1164_s17, %s19_s17   ;;  %s1124_s16 = sphi %s1162_s16, %s1454_s16   ;;  %s1120_s15 = sphi %s1160_s15, %s1453_s15   ;;  %s1116_s14 = sphi %s1158_s14, %s1452_s14   ;;  %s1112_s13 = sphi %s1156_s13, %s1451_s13   ;;  %s1108_s12 = sphi %s1154_s12, %s1450_s12  }
   0x7   : > { %s31_s20 = sadd.s32 1, %s1124_s16  ;;  %s38_s21 = sadd.s32 1, %s1116_s14 }
   0x8   : > { %p33_p0 = scmp.ge.s32.totalorder %s31_s20, 2  ;;  %p45_p1 = scmp.ne.s32.totalorder %s1116_s14, %s1112_s13 }
   0x9   : > { %p46_p2 = scmp.eq.s32.totalorder %s1128_s17, 0  ;;  %p51_p3 = scmp.ne.s32.totalorder %s1112_s13, %s1108_s12 }
   0xa   : > { %s1456_s20 = smov (%p33_p0, %s31_s20), 0  ;;  %p52_p5 = scmp.eq.s32.totalorder %s858_s18, 0 }
   0xb   : > { %p1195_p4 = por %p46_p2, %p45_p1  ;;  %s35_s23 = ssub.s32 %s1124_s16, %s1456_s20 }
   0xc   : > { %p124_p6 = scmp.eq.s32.totalorder %s858_s18, 1  ;;  %p36_p7 = scmp.eq.s32.totalorder %s35_s23, 0 }
   0xd   : > { %p1201_p8 = por %p52_p5, %p51_p3  ;;  %p130_p10 = scmp.eq.s32.totalorder %s859_s19, 1 }
   0xe   : > { %p1205_p9 = por %p124_p6, %p45_p1  ;;  %p862_p12 = scmp.ge.s32.totalorder %s1128_s17, 2 }
   0xf   : > { %s1210_s26 = scalar_select %p36_p7, %s1116_s14, %s38_s21  }
  0x10   : > { %p1212_p11 = por %p130_p10, %p51_p3  ;;  %p962_p13 = scmp.lt.s32.totalorder %s1128_s17, 2 }
  0x11   : > { %s162_s28 = sand.u32 1, %s1116_s14   ;;  %s941_s30 = sshll.u32 %s1124_s16, 7 }
  0x12   : > { %s863_s29 = sshll.u32 %s162_s28, 7  ;;  %s172_s6 = scalar_lea.hbm %s1442_s0, %s941_s30 }
  0x13   : > { %s166_s7 = scalar_lea.vmem [#allocation2], %s863_s29  ;;  %s173_s9 = sshll.u32 %s172_s6, 4  ;;  %s174_s9 = int_to_ptr.hbm [resolvable:$true] %s173_s9 }
  0x14   : > { %s175_s8 = sshll.u32 %s166_s7, 4  ;;  %p955_p0 = pnand %p962_p13, %p1195_p4  ;;  %s176_s8 = int_to_ptr.vmem [resolvable:$true] %s175_s8 }
  0x15   : > { %p867_p1 = scmp.ge.s32.totalorder %s1128_s17, 1  ;;  %s163_s10 = scalar_lea.sflag [#allocation3], %s162_s28 }
  0x16   : > { %s1130_s11 = smov 128   ;;  %s1131_s18 = smov 8  }
  0x17   : > { %957 = dma.hbm_to_vmem [thread:$0]  (!%p955_p0), %s174_s9, 2048, %s176_s8, %s163_s10, %s1130_s11, %s1130_s11, %s1131_s18  }
  0x18   : > { %p183_p2 = scmp.lt.s32.totalorder %s1128_s17, 3 }
  0x1a   : > { %p184_p3 = pnand %p867_p1, %p183_p2 }
  0x1b   : > { %s1228_s19 = sand.u32 (!%p184_p3), 1, %s1112_s13  }
  0x1c   : > { %187 = sbr.rel (%p184_p3) target bundleno = 394 (0x18a), region = 32  ;;  %s868_s21 = sshll.u32 (!%p184_p3), %s1228_s19, 7 }
  0x1d   : > { %s190_s23 = scalar_lea.sflag (!%p184_p3), [#allocation3], %s1228_s19  ;;  %s1232_s29 = scalar_lea.vmem (!%p184_p3), [#allocation2], %s868_s21 }
  0x21   : > { %1099 = dma.done.wait (%p1201_p8), %s190_s23, 2048  }
  0x22   : > { %1101 = vsyncadd (%p1201_p8), %s190_s23, 4294965248  ;;  %v236_v0 = vld [vmem:[%s1232_s29 + $0x28] sm:$0xff]  ;;  %v235_v1 = vld [vmem:[%s1232_s29 + $0x20] sm:$0xff]  ;;  %vm251_vm0 = vcmask 130048   ;;  %s869_s18 = sshll.u32 %s1228_s19, 8  ;;  %vm707_vm1 = vcmask 261120  }
  0x23   : > { %336 = vmatpush.msra.mxu2 %v236_v0  ;;  %v247_v2 = vld [vmem:[%s1443_s1] sm:$0xff]  ;;  %v232_v3 = vld [vmem:[%s1232_s29 + $0x8] sm:$0xff]  ;;  %v238_v8 = vld [vmem:[%s1232_s29 + $0x38] sm:$0xff]  ;;  %s1337_s21 = scalar_lea.vmem [#allocation5], %s869_s18  ;;  %s943_s23 = sshll.u32 %s1120_s15, 8 }
  0x24   : > { %v231_v4 = vld [vmem:[%s1232_s29] sm:$0xff]  ;;  %v244_v5 = vld [vmem:[%s1232_s29 + $0x68] sm:$0xff]  ;;  %278 = vmatpush.msra.mxu0 %v232_v3  ;;  %v237_v10 = vld [vmem:[%s1232_s29 + $0x30] sm:$0xff]  ;;  %365 = vmatpush.msra.mxu3 %v238_v8  ;;  %s755_s28 = scalar_lea.hbm %s1445_s3, %s943_s23  ;;  %s756_s24 = sshll.u32 %s1337_s21, 4  ;;  %s757_s24 = int_to_ptr.vmem [resolvable:$true] %s756_s24 }
  0x25   : > { %337 = vmatpush.msra.mxu2 %v235_v1  ;;  %v240_v6 = vld [vmem:[%s1232_s29 + $0x48] sm:$0xff]  ;;  %v243_v7 = vld [vmem:[%s1232_s29 + $0x60] sm:$0xff]  ;;  %v234_v11 = vld [vmem:[%s1232_s29 + $0x18] sm:$0xff]  ;;  %s758_s30 = sshll.u32 %s755_s28, 4  ;;  %s741_s4 = scalar_lea.sflag [#allocation4], %s1228_s19  ;;  %s759_s30 = int_to_ptr.hbm [resolvable:$true] %s758_s30 }
  0x26   : > { %878 = vmatmul.msk.f32.vlgmr.msra.gmra.mxu2 %vm251_vm0, %v247_v2  ;;  %279 = vmatpush.msra.mxu0 %v231_v4  ;;  %v239_v9 = vld [vmem:[%s1232_s29 + $0x40] sm:$0xff]  ;;  %v233_v12 = vld [vmem:[%s1232_s29 + $0x10] sm:$0xff]  ;;  %v246_v13 = vld [vmem:[%s1232_s29 + $0x78] sm:$0xff]  ;;  %s1060_s15 = sshra.s32 %s759_s30, 4  ;;  %s1066_s8 = scalar_lea.hbm %s1445_s3, 512  ;;  %s1061_s15 = int_to_ptr.hbm [resolvable:$true] %s1060_s15 }
  0x27   : > { %452 = vmatpush.msrb.mxu2 %v244_v5  ;;  %870 = vmatmul.msk.f32.vlgmr.msra.gmra.mxu0 %vm251_vm0, %v247_v2  ;;  %v242_v14 = vld [vmem:[%s1232_s29 + $0x58] sm:$0xff]  ;;  %v248_v15 = vld [vmem:[%s1443_s1 + $0x8] sm:$0xff]  ;;  %v249_v16 = vld [vmem:[%s1443_s1 + $0x10] sm:$0xff]  ;;  %s1062_s5 = scalar_lea.hbm %s1061_s15, 256  ;;  %p1067_p7 = scmp.lt.s32.totalorder %s1061_s15, %s1445_s3 }
  0x28   : > { %394 = vmatpush.msrb.mxu0 %v240_v6  ;;  %307 = vmatpush.msra.mxu1 %v234_v11  ;;  %v245_v17 = vld [vmem:[%s1232_s29 + $0x70] sm:$0xff]  ;;  %v250_v19 = vld [vmem:[%s1443_s1 + $0x18] sm:$0xff]  ;;  %v497_v20 = vld [vmem:[%s1444_s2 + $0x8] sm:$0xff]  ;;  %p1063_p4 = scmp.ne.s32.totalorder %s1061_s15, %s1062_s5  ;;  %p1068_p8 = scmp.lt.s32.totalorder %s1066_s8, %s1062_s5 }
  0x29   : > { %453 = vmatpush.msrb.mxu2 %v243_v7  ;;  %366 = vmatpush.msra.mxu3 %v237_v10  ;;  %v241_v18 = vld [vmem:[%s1232_s29 + $0x50] sm:$0xff]  ;;  %v496_v21 = vld [vmem:[%s1444_s2] sm:$0xff] }
  0x2a   : > { %395 = vmatpush.msrb.mxu0 %v239_v9  ;;  %882 = vmatmul.msk.f32.vlgmr.msra.gmra.mxu3 %vm251_vm0, %v247_v2  ;;  %p1064_p5 = pnand %p1063_p4, %p1205_p9  ;;  %p1069_p10 = por %p1068_p8, %p1067_p7 }
  0x2b   : > { %308 = vmatpush.msra.mxu1 %v233_v12  ;;  %481 = vmatpush.msrb.mxu3 %v246_v13 }
  0x2c   : > { %874 = vmatmul.msk.f32.vlgmr.msra.gmra.mxu1 %vm251_vm0, %v247_v2  ;;  %608 = vmatpush.msra.mxu0 %v497_v20  ;;  %p1065_p6 = pneg %p1064_p5 }
  0x2d   : > { %423 = vmatpush.msrb.mxu1 %v242_v14  ;;  %482 = vmatpush.msrb.mxu3 %v245_v17 }
  0x2e   : > { %879 = vmatmul.msk.f32.gmra.mxu2 %vm251_vm0, %v248_v15  ;;  %609 = vmatpush.msra.mxu0 %v496_v21  ;;  %p1070_p13 = pnand %p1069_p10, %p1065_p6 }
  0x2f   : > { %871 = vmatmul.msk.f32.gmra.mxu0 %vm251_vm0, %v248_v15  ;;  %424 = vmatpush.msrb.mxu1 %v241_v18 }
  0x30   : > { %946 = vmatpush.msra.mxu3 %v497_v20  ;;  %945 = vmatpush.msra.mxu2 %v497_v20 }
  0x31   : > { %944 = vmatpush.msra.mxu1 %v497_v20 }
  0x32   : > { %883 = vmatmul.msk.f32.gmra.mxu3 %vm251_vm0, %v248_v15  ;;  %948 = vmatpush.msra.mxu2 %v496_v21 }
  0x33   : > { %947 = vmatpush.msra.mxu1 %v496_v21  ;;  %949 = vmatpush.msra.mxu3 %v496_v21 }
  0x34   : > { %875 = vmatmul.msk.f32.gmra.mxu1 %vm251_vm0, %v248_v15 }
  0x36   : > { %880 = vmatmul.msk.f32.gmra.mxu2 %vm251_vm0, %v249_v16 }
  0x37   : > { %872 = vmatmul.msk.f32.gmra.mxu0 %vm251_vm0, %v249_v16 }
  0x3a   : > { %884 = vmatmul.msk.f32.gmra.mxu3 %vm251_vm0, %v249_v16 }
  0x3c   : > { %876 = vmatmul.msk.f32.gmra.mxu1 %vm251_vm0, %v249_v16 }
  0x3e   : > { %881 = vmatmul.msk.f32.gmra.mxu2 %vm251_vm0, %v250_v19 }
  0x3f   : > { %873 = vmatmul.msk.f32.gmra.mxu0 %vm251_vm0, %v250_v19 }
  0x42   : > { %885 = vmatmul.msk.f32.gmra.mxu3 %vm251_vm0, %v250_v19 }
  0x44   : > { %877 = vmatmul.msk.f32.gmra.mxu1 %vm251_vm0, %v250_v19 }
  0x46   : > { %894 = vmatmul.msk.f32.vlgmr.msrb.gmra.mxu2 %vm251_vm0, %v247_v2 }
  0x47   : > { %886 = vmatmul.msk.f32.vlgmr.msrb.gmra.mxu0 %vm251_vm0, %v247_v2 }
  0x4a   : > { %898 = vmatmul.msk.f32.vlgmr.msrb.gmra.mxu3 %vm251_vm0, %v247_v2 }
  0x4c   : > { %890 = vmatmul.msk.f32.vlgmr.msrb.gmra.mxu1 %vm251_vm0, %v247_v2 }
  0x4e   : > { %895 = vmatmul.msk.f32.gmra.mxu2 %vm251_vm0, %v248_v15 }
  0x4f   : > { %887 = vmatmul.msk.f32.gmra.mxu0 %vm251_vm0, %v248_v15 }
  0x52   : > { %899 = vmatmul.msk.f32.gmra.mxu3 %vm251_vm0, %v248_v15 }
  0x54   : > { %891 = vmatmul.msk.f32.gmra.mxu1 %vm251_vm0, %v248_v15 }
  0x56   : > { %896 = vmatmul.msk.f32.gmra.mxu2 %vm251_vm0, %v249_v16 }
  0x57   : > { %888 = vmatmul.msk.f32.gmra.mxu0 %vm251_vm0, %v249_v16 }
  0x5a   : > { %900 = vmatmul.msk.f32.gmra.mxu3 %vm251_vm0, %v249_v16 }
  0x5c   : > { %892 = vmatmul.msk.f32.gmra.mxu1 %vm251_vm0, %v249_v16 }
  0x5e   : > { %897 = vmatmul.msk.f32.gmra.mxu2 %vm251_vm0, %v250_v19 }
  0x5f   : > { %889 = vmatmul.msk.f32.gmra.mxu0 %vm251_vm0, %v250_v19 }
  0x62   : > { %901 = vmatmul.msk.f32.gmra.mxu3 %vm251_vm0, %v250_v19 }
  0x64   : > { %893 = vmatmul.msk.f32.gmra.mxu1 %vm251_vm0, %v250_v19 }
  0xa4   : > { %v281_v22 = vpop.f32.mrf.mxu0 }
  0xa5   : > { %902 = vmatmul.msk.f32.vlgmr.msra.gmra.mxu0 %vm251_vm0, %v281_v22 }
  0xa9   : > { %v339_v23 = vpop.f32.mrf.mxu2  ;;  %v310_v27 = vpop.f32.mrf.mxu1 }
  0xaa   : > { %910 = vmatmul.msk.f32.vlgmr.msra.gmra.mxu1 %vm251_vm0, %v339_v23 }
  0xac   : > { %v284_v24 = vpop.f32.mrf.mxu0 }
  0xad   : > { %903 = vmatmul.msk.f32.gmra.mxu0 %vm251_vm0, %v284_v24  ;;  %v368_v29 = vpop.f32.mrf.mxu3 }
  0xb1   : > { %v342_v25 = vpop.f32.mrf.mxu2  ;;  %v313_v31 = vpop.f32.mrf.mxu1 }
  0xb2   : > { %911 = vmatmul.msk.f32.gmra.mxu1 %vm251_vm0, %v342_v25 }
  0xb4   : > { %v287_v26 = vpop.f32.mrf.mxu0 }
  0xb5   : > { %904 = vmatmul.msk.f32.gmra.mxu0 %vm251_vm0, %v287_v26  ;;  %v371_v33 = vpop.f32.mrf.mxu3 }
  0xb9   : > { %v345_v28 = vpop.f32.mrf.mxu2  ;;  %v316_v35 = vpop.f32.mrf.mxu1 }
  0xba   : > { %912 = vmatmul.msk.f32.gmra.mxu1 %vm251_vm0, %v345_v28 }
  0xbc   : > { %v290_v30 = vpop.f32.mrf.mxu0 }
  0xbd   : > { %905 = vmatmul.msk.f32.gmra.mxu0 %vm251_vm0, %v290_v30  ;;  %v374_v38 = vpop.f32.mrf.mxu3 }
  0xc1   : > { %v348_v32 = vpop.f32.mrf.mxu2  ;;  %v319_v40 = vpop.f32.mrf.mxu1 }
  0xc2   : > { %913 = vmatmul.msk.f32.gmra.mxu1 %vm251_vm0, %v348_v32 }
  0xc4   : > { %v397_v34 = vpop.f32.mrf.mxu0 }
  0xc5   : > { %906 = vmatmul.msk.f32.gmra.mxu0 %vm251_vm0, %v310_v27  ;;  %918 = vmatmul.msk.f32.vlgmr.msra.gmra.mxu2 %vm251_vm0, %v397_v34  ;;  %v377_v42 = vpop.f32.mrf.mxu3 }
  0xc9   : > { %v455_v36 = vpop.f32.mrf.mxu2  ;;  %v426_v45 = vpop.f32.mrf.mxu1 }
  0xca   : > { %914 = vmatmul.msk.f32.gmra.mxu1 %vm251_vm0, %v368_v29  ;;  %926 = vmatmul.msk.f32.vlgmr.msra.gmra.mxu3 %vm251_vm0, %v455_v36 }
  0xcc   : > { %v400_v37 = vpop.f32.mrf.mxu0 }
  0xcd   : > { %907 = vmatmul.msk.f32.gmra.mxu0 %vm251_vm0, %v313_v31  ;;  %919 = vmatmul.msk.f32.gmra.mxu2 %vm251_vm0, %v400_v37  ;;  %v484_v47 = vpop.f32.mrf.mxu3 }
  0xd1   : > { %v458_v39 = vpop.f32.mrf.mxu2  ;;  %v429_v48 = vpop.f32.mrf.mxu1 }
  0xd2   : > { %915 = vmatmul.msk.f32.gmra.mxu1 %vm251_vm0, %v371_v33  ;;  %927 = vmatmul.msk.f32.gmra.mxu3 %vm251_vm0, %v458_v39 }
  0xd4   : > { %v403_v41 = vpop.f32.mrf.mxu0 }
  0xd5   : > { %908 = vmatmul.msk.f32.gmra.mxu0 %vm251_vm0, %v316_v35  ;;  %920 = vmatmul.msk.f32.gmra.mxu2 %vm251_vm0, %v403_v41  ;;  %v487_v49 = vpop.f32.mrf.mxu3 }
  0xd9   : > { %v461_v43 = vpop.f32.mrf.mxu2  ;;  %v432_v50 = vpop.f32.mrf.mxu1 }
  0xda   : > { %916 = vmatmul.msk.f32.gmra.mxu1 %vm251_vm0, %v374_v38  ;;  %928 = vmatmul.msk.f32.gmra.mxu3 %vm251_vm0, %v461_v43 }
  0xdc   : > { %v406_v44 = vpop.f32.mrf.mxu0 }
  0xdd   : > { %909 = vmatmul.msk.f32.gmra.mxu0 %vm251_vm0, %v319_v40  ;;  %921 = vmatmul.msk.f32.gmra.mxu2 %vm251_vm0, %v406_v44  ;;  %v490_v51 = vpop.f32.mrf.mxu3 }
  0xe1   : > { %v464_v46 = vpop.f32.mrf.mxu2  ;;  %v435_v52 = vpop.f32.mrf.mxu1 }
  0xe2   : > { %917 = vmatmul.msk.f32.gmra.mxu1 %vm251_vm0, %v377_v42  ;;  %929 = vmatmul.msk.f32.gmra.mxu3 %vm251_vm0, %v464_v46 }
  0xe5   : > { %922 = vmatmul.msk.f32.gmra.mxu2 %vm251_vm0, %v426_v45  ;;  %v493_v53 = vpop.f32.mrf.mxu3 }
  0xea   : > { %930 = vmatmul.msk.f32.gmra.mxu3 %vm251_vm0, %v484_v47 }
  0xed   : > { %923 = vmatmul.msk.f32.gmra.mxu2 %vm251_vm0, %v429_v48 }
  0xf2   : > { %931 = vmatmul.msk.f32.gmra.mxu3 %vm251_vm0, %v487_v49 }
  0xf5   : > { %924 = vmatmul.msk.f32.gmra.mxu2 %vm251_vm0, %v432_v50 }
  0xfa   : > { %932 = vmatmul.msk.f32.gmra.mxu3 %vm251_vm0, %v490_v51 }
  0xfd   : > { %925 = vmatmul.msk.f32.gmra.mxu2 %vm251_vm0, %v435_v52 }
 0x102   : > { %933 = vmatmul.msk.f32.gmra.mxu3 %vm251_vm0, %v493_v53 }
 0x122   : > { %v611_v54 = vpop.f32.mrf.mxu0 }
 0x123   : > { %708 = vst.msk [vmem:[%s1337_s21] sm:$0xff] %vm707_vm1, %v611_v54 }
 0x127   : > { %v635_v55 = vpop.f32.mrf.mxu1 }
 0x128   : > { %716 = vst.msk [vmem:[%s1337_s21 + $0x40] sm:$0xff] %vm707_vm1, %v635_v55 }
 0x12a   : > { %v614_v56 = vpop.f32.mrf.mxu0 }
 0x12b   : > { %709 = vst.msk [vmem:[%s1337_s21 + $0x8] sm:$0xff] %vm707_vm1, %v614_v56 }
 0x12f   : > { %v638_v57 = vpop.f32.mrf.mxu1 }
 0x130   : > { %717 = vst.msk [vmem:[%s1337_s21 + $0x48] sm:$0xff] %vm707_vm1, %v638_v57 }
 0x132   : > { %v617_v58 = vpop.f32.mrf.mxu0 }
 0x133   : > { %710 = vst.msk [vmem:[%s1337_s21 + $0x10] sm:$0xff] %vm707_vm1, %v617_v58 }
 0x137   : > { %v641_v59 = vpop.f32.mrf.mxu1 }
 0x138   : > { %718 = vst.msk [vmem:[%s1337_s21 + $0x50] sm:$0xff] %vm707_vm1, %v641_v59 }
 0x13a   : > { %v620_v60 = vpop.f32.mrf.mxu0 }
 0x13b   : > { %711 = vst.msk [vmem:[%s1337_s21 + $0x18] sm:$0xff] %vm707_vm1, %v620_v60 }
 0x13f   : > { %v644_v61 = vpop.f32.mrf.mxu1 }
 0x140   : > { %719 = vst.msk [vmem:[%s1337_s21 + $0x58] sm:$0xff] %vm707_vm1, %v644_v61 }
 0x142   : > { %v623_v62 = vpop.f32.mrf.mxu0 }
 0x143   : > { %712 = vst.msk [vmem:[%s1337_s21 + $0x20] sm:$0xff] %vm707_vm1, %v623_v62 }
 0x147   : > { %v647_v63 = vpop.f32.mrf.mxu1 }
 0x148   : > { %720 = vst.msk [vmem:[%s1337_s21 + $0x60] sm:$0xff] %vm707_vm1, %v647_v63  ;;  %v659_v0 = vpop.f32.mrf.mxu2 }
 0x149   : > { %724 = vst.msk [vmem:[%s1337_s21 + $0x80] sm:$0xff] %vm707_vm1, %v659_v0 }
 0x14a   : > { %v626_v1 = vpop.f32.mrf.mxu0 }
 0x14b   : > { %713 = vst.msk [vmem:[%s1337_s21 + $0x28] sm:$0xff] %vm707_vm1, %v626_v1 }
 0x14d   : > { %v683_v2 = vpop.f32.mrf.mxu3 }
 0x14e   : > { %732 = vst.msk [vmem:[%s1337_s21 + $0xc0] sm:$0xff] %vm707_vm1, %v683_v2 }
 0x14f   : > { %v650_v3 = vpop.f32.mrf.mxu1 }
 0x150   : > { %721 = vst.msk [vmem:[%s1337_s21 + $0x68] sm:$0xff] %vm707_vm1, %v650_v3  ;;  %v662_v4 = vpop.f32.mrf.mxu2 }
 0x151   : > { %725 = vst.msk [vmem:[%s1337_s21 + $0x88] sm:$0xff] %vm707_vm1, %v662_v4 }
 0x152   : > { %v629_v5 = vpop.f32.mrf.mxu0 }
 0x153   : > { %714 = vst.msk [vmem:[%s1337_s21 + $0x30] sm:$0xff] %vm707_vm1, %v629_v5 }
 0x155   : > { %v686_v6 = vpop.f32.mrf.mxu3 }
 0x156   : > { %733 = vst.msk [vmem:[%s1337_s21 + $0xc8] sm:$0xff] %vm707_vm1, %v686_v6 }
 0x157   : > { %v653_v7 = vpop.f32.mrf.mxu1 }
 0x158   : > { %722 = vst.msk [vmem:[%s1337_s21 + $0x70] sm:$0xff] %vm707_vm1, %v653_v7  ;;  %v665_v8 = vpop.f32.mrf.mxu2 }
 0x159   : > { %726 = vst.msk [vmem:[%s1337_s21 + $0x90] sm:$0xff] %vm707_vm1, %v665_v8 }
 0x15a   : > { %v632_v9 = vpop.f32.mrf.mxu0 }
 0x15b   : > { %715 = vst.msk [vmem:[%s1337_s21 + $0x38] sm:$0xff] %vm707_vm1, %v632_v9 }
 0x15d   : > { %v689_v10 = vpop.f32.mrf.mxu3 }
 0x15e   : > { %734 = vst.msk [vmem:[%s1337_s21 + $0xd0] sm:$0xff] %vm707_vm1, %v689_v10 }
 0x15f   : > { %v656_v11 = vpop.f32.mrf.mxu1 }
 0x160   : > { %723 = vst.msk [vmem:[%s1337_s21 + $0x78] sm:$0xff] %vm707_vm1, %v656_v11  ;;  %v668_v12 = vpop.f32.mrf.mxu2 }
 0x161   : > { %727 = vst.msk [vmem:[%s1337_s21 + $0x98] sm:$0xff] %vm707_vm1, %v668_v12 }
 0x165   : > { %v692_v13 = vpop.f32.mrf.mxu3 }
 0x166   : > { %735 = vst.msk [vmem:[%s1337_s21 + $0xd8] sm:$0xff] %vm707_vm1, %v692_v13 }
 0x168   : > { %v671_v14 = vpop.f32.mrf.mxu2 }
 0x169   : > { %728 = vst.msk [vmem:[%s1337_s21 + $0xa0] sm:$0xff] %vm707_vm1, %v671_v14 }
 0x16d   : > { %v695_v15 = vpop.f32.mrf.mxu3 }
 0x16e   : > { %736 = vst.msk [vmem:[%s1337_s21 + $0xe0] sm:$0xff] %vm707_vm1, %v695_v15 }
 0x170   : > { %v674_v16 = vpop.f32.mrf.mxu2 }
 0x171   : > { %729 = vst.msk [vmem:[%s1337_s21 + $0xa8] sm:$0xff] %vm707_vm1, %v674_v16 }
 0x175   : > { %v698_v17 = vpop.f32.mrf.mxu3 }
 0x176   : > { %737 = vst.msk [vmem:[%s1337_s21 + $0xe8] sm:$0xff] %vm707_vm1, %v698_v17 }
 0x178   : > { %v677_v18 = vpop.f32.mrf.mxu2 }
 0x179   : > { %730 = vst.msk [vmem:[%s1337_s21 + $0xb0] sm:$0xff] %vm707_vm1, %v677_v18 }
 0x17d   : > { %v701_v19 = vpop.f32.mrf.mxu3 }
 0x17e   : > { %738 = vst.msk [vmem:[%s1337_s21 + $0xf0] sm:$0xff] %vm707_vm1, %v701_v19 }
 0x180   : > { %v680_v20 = vpop.f32.mrf.mxu2 }
 0x181   : > { %731 = vst.msk [vmem:[%s1337_s21 + $0xb8] sm:$0xff] %vm707_vm1, %v680_v20 }
 0x185   : > { %v704_v21 = vpop.f32.mrf.mxu3 }
 0x186   : > { %739 = vst.msk [vmem:[%s1337_s21 + $0xf8] sm:$0xff] %vm707_vm1, %v704_v21 }
 0x187   : > { %1073 = shalt.err (!%p1070_p13)
}
 0x188   : > { %s1132_s19 = smov 128   ;;  %s1133_s11 = smov 8  }
 0x189   : > { %952 = dma.vmem_to_hbm [thread:$0]  (%p1205_p9), %s757_s24, 4096, %s759_s30, %s741_s4, %s1132_s19, %s1132_s19, %s1133_s11  }
 0x18a PF: > { %s773_s18 = sand.u32 1, %s1108_s12   ;;  %p959_p0 = pnand %p862_p12, %p1212_p11 }
 0x18b   : > { %s774_s21 = scalar_lea.sflag [#allocation4], %s773_s18 }
 0x18c   : > { %p960_p1 = pneg %p959_p0 }
 0x18e   : > { %1103 = dma.done.wait (%p960_p1), %s774_s21, 4096  }
 0x18f   : > { %1105 = vsyncadd (%p960_p1), %s774_s21, 4294963200  ;;  %s19_s17 = sadd.s32 1, %s1128_s17   ;;  %s1450_s12 = smov %s1112_s13 }
 0x190   : > { %p16_p2 = scmp.ge.s32.totalorder %s19_s17, 4   ;;  %s1451_s13 = smov %s1116_s14 }
 0x191   : > { %s1452_s14 = smov %s1210_s26  ;;  %s1453_s15 = smov %s1124_s16 }
 0x192   : > { %s1454_s16 = smov %s1456_s20  ;;  %18 = sbr.rel (!%p16_p2) target bundleno = 6 (0x6), region = 80 }
 0x197   :  { %780 = vsyncpa [#allocation3], 1 }
 0x198   :  { %782 = vsyncpa [#allocation3 + $0x1], 1 }
 0x199   :  { %783 = vsyncpa [#allocation4], 1 }
 0x19a   :  { %785 = vsyncpa [#allocation4 + $0x1], 1 }

</bundles_post_ra>
